<compile_context>
chip_gen: v7x
topology: tpu7x:2x2x1
jax: 0.10.0
libtpu: 0.0.40
codegen_flags: <defaults>
</compile_context>

<pallas_src>
import jax
import jax.numpy as jnp
from jax.experimental import pallas as pl
from jax.experimental.pallas import tpu as pltpu


def _round_up(x, m):
    return (x + m - 1) // m * m


def ffn_kernel(x_ref, w1_ref, b1_ref, w2_ref, b2_ref, o_ref, acc_ref):
    # x_ref:   (tm, d_model)   token tile (compute dtype)
    # w1_ref:  (d_model, tf)   streamed/resident W1 tile (compute dtype)
    # b1_ref:  (1, tf)         f32
    # w2_ref:  (tf, tn)        streamed/resident W2 tile (compute dtype)
    # b2_ref:  (1, tn)         f32
    # o_ref:   (tm, tn)
    # acc_ref: (tm, tn)        f32 accumulator, persists across the d_ff axis
    j = pl.program_id(2)

    @pl.when(j == 0)
    def _init():
        # Seed the accumulator with b2 so the epilogue is a pure cast + store.
        acc_ref[...] = jnp.broadcast_to(b2_ref[...].astype(jnp.float32),
                                        acc_ref.shape)

    # First matmul tile (MXU) + bias + ReLU on the (tm, tf) slab.
    h = jnp.dot(x_ref[...], w1_ref[...], preferred_element_type=jnp.float32)
    h = jnp.maximum(h + b1_ref[...].astype(jnp.float32), 0.0)

    # Second matmul: accumulate this d_ff slice's (tm, tn) contribution.
    # Mixed precision: h is downcast to the weight compute dtype for the MXU,
    # accumulation stays f32.
    acc_ref[...] += jnp.dot(h.astype(w2_ref.dtype), w2_ref[...],
                            preferred_element_type=jnp.float32)

    @pl.when(j == pl.num_programs(2) - 1)
    def _finalize():
        o_ref[...] = acc_ref[...].astype(o_ref.dtype)


def feed_forward(x, w1, b1, w2, b2, *, compute_dtype=jnp.bfloat16,
                 tm=None, tf=None, tn=None):
    """x: (..., d_model) -> (..., d_model). Fused Linear-ReLU-Linear.

    w1: (d_model, d_ff), w2: (d_ff, d_model) -- i.e. nn.Linear weights
    transposed.  The MXU runs in `compute_dtype` (bf16 by default) with f32
    accumulation; the output dtype matches x.dtype.
    """
    d_model = x.shape[-1]
    d_ff = w1.shape[-1]
    lead = x.shape[:-1]
    out_dtype = x.dtype

    x2d = x.reshape(-1, d_model).astype(compute_dtype)
    w1c = w1.astype(compute_dtype)
    w2c = w2.astype(compute_dtype)
    b1f = b1.reshape(1, d_ff).astype(jnp.float32)
    b2f = b2.reshape(1, d_model).astype(jnp.float32)

    M = x2d.shape[0]
    c_isz = jnp.dtype(compute_dtype).itemsize
    o_isz = jnp.dtype(out_dtype).itemsize
    pack = max(8, 32 // max(c_isz, 1))        # 8 f32 / 16 bf16 / 32 int8-fp8

    # --- chip VMEM budget (v7x: 64 MiB/TC, v5e/v6e: 128 MiB) ---------------
    try:
        vmem_cap = int(getattr(pltpu.get_tpu_info(), "vmem_capacity_bytes",
                               64 << 20))
    except Exception:
        vmem_cap = 64 << 20
    if vmem_cap <= 0:
        vmem_cap = 64 << 20
    budget = vmem_cap - (8 << 20)             # leave ~8 MiB headroom

    # --- output-column tile (optional v7x second-core split) ---------------
    if tn is None:
        tn = d_model
    if tn != d_model and (d_model % tn != 0 or tn % 128 != 0):
        raise ValueError(f"tn={tn} must divide d_model={d_model} and be a "
                         f"multiple of 128")

    def working(tm_, tf_, tn_):
        # Conservative per-step VMEM working set (double-buffered blocks,
        # f32 accumulator, worst-case materialized intermediate h).
        return (2 * tm_ * d_model * c_isz      # x tile
                + 2 * d_model * tf_ * c_isz    # W1 tile
                + 2 * tf_ * tn_ * c_isz        # W2 tile
                + 2 * (tf_ + tn_) * 4          # bias tiles (f32)
                + 2 * tm_ * tn_ * o_isz        # out tile
                + tm_ * tn_ * 4                # f32 accumulator scratch
                + tm_ * tf_ * 4)               # f32 intermediate h

    # --- d_ff tile: keep weights resident when they fit --------------------
    if tf is None:
        tf = d_ff
        if working(pack, d_ff, tn) > budget:   # must stream the weights
            for cand in (2048, 1024, 512, 256, 128):
                if cand < d_ff and d_ff % cand == 0:
                    tf = cand
                    if working(pack, tf, tn) <= budget:
                        break
    if d_ff % tf != 0:
        raise ValueError(f"d_ff={d_ff} must be divisible by tf={tf}")
    if tf != d_ff and tf % 128 != 0:
        raise ValueError(f"tf={tf} must be a multiple of 128 (or equal d_ff)")

    # --- token tile: big and pack-aligned, shrunk to the VMEM budget -------
    if tm is None:
        tm = 1024 if (d_ff // tf) > 1 else 512   # larger in streamed regime
    tm = min(_round_up(tm, pack), _round_up(M, pack))
    tm = max(tm, pack)
    while tm > pack and working(tm, tf, tn) > budget:
        tm = max(pack, _round_up(tm // 2, pack))
    while (working(tm, tf, tn) > budget and tf > 128
           and d_ff % (tf // 2) == 0 and (tf // 2) % 128 == 0):
        tf //= 2

    # --- pad the token axis to a multiple of tm (tiny pad fraction) --------
    # TODO(synk): replace pad/slice with an in-kernel masked tail store if the
    # out-of-kernel HBM round trip ever shows up in profiles.
    M_pad = _round_up(M, tm)
    if M_pad != M:
        x2d = jnp.pad(x2d, ((0, M_pad - M), (0, 0)))

    grid = (M_pad // tm, d_model // tn, d_ff // tf)
    grid_m, grid_n, grid_j = grid

    w = working(tm, tf, tn)
    vmem_limit = int(min(max(w + w // 4 + (2 << 20), 16 << 20), budget))

    # Advisory cost estimate: first matmul is recomputed per column tile.
    flops = 2 * M_pad * d_model * d_ff * (grid_n + 1)
    weight_bytes = (w1c.size + w2c.size) * c_isz + (b1f.size + b2f.size) * 4
    weight_streams = 1 if grid_j == 1 else grid_m * grid_n
    bytes_accessed = (M_pad * d_model * (c_isz + o_isz)
                      + weight_bytes * weight_streams)

    out = pl.pallas_call(
        ffn_kernel,
        out_shape=jax.ShapeDtypeStruct((M_pad, d_model), out_dtype),
        grid_spec=pltpu.PrefetchScalarGridSpec(
            num_scalar_prefetch=0,
            grid=grid,
            in_specs=[
                pl.BlockSpec((tm, d_model), lambda i, n, j: (i, 0)),  # x
                pl.BlockSpec((d_model, tf), lambda i, n, j: (0, j)),  # W1
                pl.BlockSpec((1, tf),       lambda i, n, j: (0, j)),  # b1
                pl.BlockSpec((tf, tn),      lambda i, n, j: (j, n)),  # W2
                pl.BlockSpec((1, tn),       lambda i, n, j: (0, n)),  # b2
            ],
            out_specs=pl.BlockSpec((tm, tn), lambda i, n, j: (i, n)),
            scratch_shapes=[pltpu.VMEM((tm, tn), jnp.float32)],
        ),
        compiler_params=pltpu.CompilerParams(
            dimension_semantics=("parallel", "parallel", "arbitrary"),
            vmem_limit_bytes=vmem_limit,
        ),
        cost_estimate=pl.CostEstimate(
            flops=flops, transcendentals=0, bytes_accessed=bytes_accessed),
    )(x2d, w1c, b1f, w2c, b2f)

    if M_pad != M:
        out = out[:M]
    return out.reshape(*lead, d_model)


if __name__ == "__main__":
    # Small shapes consistent with the module (d_model scaled down from 768).
    batch, seq = 2, 8
    d_model_s, d_ff_s = 128, 256

    key = jax.random.PRNGKey(0)
    kx, kw1, kb1, kw2, kb2 = jax.random.split(key, 5)

    x = jax.random.normal(kx, (batch, seq, d_model_s), dtype=jnp.float32)
    # Deterministic "Linear" params; stored as (in, out) for the kernel.
    w1 = jax.random.normal(kw1, (d_model_s, d_ff_s), dtype=jnp.float32) * 0.05
    b1 = jax.random.normal(kb1, (d_ff_s,), dtype=jnp.float32) * 0.05
    w2 = jax.random.normal(kw2, (d_ff_s, d_model_s), dtype=jnp.float32) * 0.05
    b2 = jax.random.normal(kb2, (d_model_s,), dtype=jnp.float32) * 0.05

    # Pure-JAX f32 reference (same semantics as the PyTorch module).
    ref = jnp.maximum(x @ w1 + b1, 0.0) @ w2 + b2

    # 1) Default path: bf16 MXU, auto tiles (weights resident, single j step).
    out = jax.block_until_ready(feed_forward(x, w1, b1, w2, b2))
    assert out.shape == x.shape and out.dtype == x.dtype
    assert jnp.allclose(out, ref, atol=2e-2, rtol=2e-2)

    # 2) Full-f32 path with forced d_ff streaming and multiple token tiles
    #    (grid = (2, 1, 2)) -> tight check of the accumulator init/finalize.
    out_f32 = jax.block_until_ready(
        feed_forward(x, w1, b1, w2, b2, compute_dtype=jnp.float32,
                     tm=8, tf=128))
    assert jnp.allclose(out_f32, ref, atol=1e-4, rtol=1e-4)

    # 3) Ragged token count -> exercises the padded-tail path.
    x3 = jax.random.normal(kx, (3, 5, d_model_s), dtype=jnp.float32)
    ref3 = jnp.maximum(x3 @ w1 + b1, 0.0) @ w2 + b2
    out3 = jax.block_until_ready(feed_forward(x3, w1, b1, w2, b2))
    assert out3.shape == x3.shape
    assert jnp.allclose(out3, ref3, atol=2e-2, rtol=2e-2)

    # 4) Output-column split (second TensorCore option on v7x): d_model=256,
    #    tn=128 -> grid has a second parallel axis over output columns.
    dm2 = 256
    kx2, kw1b, kb1b, kw2b, kb2b = jax.random.split(jax.random.PRNGKey(1), 5)
    x4 = jax.random.normal(kx2, (batch, seq, dm2), dtype=jnp.float32)
    w1b = jax.random.normal(kw1b, (dm2, d_ff_s), dtype=jnp.float32) * 0.05
    b1b = jax.random.normal(kb1b, (d_ff_s,), dtype=jnp.float32) * 0.05
    w2b = jax.random.normal(kw2b, (d_ff_s, dm2), dtype=jnp.float32) * 0.05
    b2b = jax.random.normal(kb2b, (dm2,), dtype=jnp.float32) * 0.05
    ref4 = jnp.maximum(x4 @ w1b + b1b, 0.0) @ w2b + b2b
    out4 = jax.block_until_ready(
        feed_forward(x4, w1b, b1b, w2b, b2b, tn=128))
    assert out4.shape == x4.shape
    assert jnp.allclose(out4, ref4, atol=2e-2, rtol=2e-2)

    print("KERNEL_OK")
</pallas_src>

<mosaic_0001>
module attributes {stable_mosaic.version = 11 : i64} {
  func.func @ffn_kernel(%arg0: i32, %arg1: i32, %arg2: i32, %arg3: memref<16x128xbf16, #tpu.memory_space<vmem>>, %arg4: memref<128x256xbf16, #tpu.memory_space<vmem>>, %arg5: memref<1x256xf32, #tpu.memory_space<vmem>>, %arg6: memref<256x128xbf16, #tpu.memory_space<vmem>>, %arg7: memref<1x128xf32, #tpu.memory_space<vmem>>, %arg8: memref<16x128xf32, #tpu.memory_space<vmem>>, %arg9: memref<16x128xf32, #tpu.memory_space<vmem>>) attributes {dimension_semantics = [#tpu.dimension_semantics<parallel>, #tpu.dimension_semantics<parallel>, #tpu.dimension_semantics<arbitrary>], iteration_bounds = array<i64: 1, 1, 1>, scalar_prefetch = 0 : i64, scratch_operands = 1 : i64, tpu.core_type = #tpu.core_type<tc>, window_params = [{transform_indices = @transform_0, window_bounds = array<i64: 16, 128>}, {transform_indices = @transform_1, window_bounds = array<i64: 128, 256>}, {transform_indices = @transform_2, window_bounds = array<i64: 1, 256>}, {transform_indices = @transform_3, window_bounds = array<i64: 256, 128>}, {transform_indices = @transform_4, window_bounds = array<i64: 1, 128>}, {transform_indices = @transform_5, window_bounds = array<i64: 16, 128>}]} {
    %c0_i32 = arith.constant 0 : i32
    %0 = arith.cmpi eq, %arg2, %c0_i32 : i32
    %1 = arith.extui %0 : i1 to i32
    %c0_i32_0 = arith.constant 0 : i32
    %2 = arith.cmpi ne, %1, %c0_i32_0 : i32
    scf.if %2 {
      %c0_16 = arith.constant 0 : index
      %c0_17 = arith.constant 0 : index
      %20 = vector.load %arg7[%c0_16, %c0_17] : memref<1x128xf32, #tpu.memory_space<vmem>>, vector<1x128xf32>
      %21 = vector.shape_cast %20 : vector<1x128xf32> to vector<1x128xf32>
      %22 = vector.broadcast %21 : vector<1x128xf32> to vector<16x128xf32>
      %c0_18 = arith.constant 0 : index
      %c0_19 = arith.constant 0 : index
      %23 = vector.load %arg9[%c0_18, %c0_19] : memref<16x128xf32, #tpu.memory_space<vmem>>, vector<16x128xf32>
      tpu.vector_store %arg9[%c0_18, %c0_19], %22 {strides = array<i32>} : memref<16x128xf32, #tpu.memory_space<vmem>>, vector<16x128xf32>,
    } else {
    }
    %c0 = arith.constant 0 : index
    %c0_1 = arith.constant 0 : index
    %3 = vector.load %arg3[%c0, %c0_1] : memref<16x128xbf16, #tpu.memory_space<vmem>>, vector<16x128xbf16>
    %c0_2 = arith.constant 0 : index
    %c0_3 = arith.constant 0 : index
    %4 = vector.load %arg4[%c0_2, %c0_3] : memref<128x256xbf16, #tpu.memory_space<vmem>>, vector<128x256xbf16>
    %cst = arith.constant dense<0.000000e+00> : vector<16x256xf32>
    %5 = tpu.matmul %3, %4, %cst {dimension_numbers = #tpu.dot_dimension_numbers<[1], [0], [0], [1], [0, 0, 1, 1], [], []>} : vector<16x128xbf16>, vector<128x256xbf16>, vector<16x256xf32> -> vector<16x256xf32>
    %c0_4 = arith.constant 0 : index
    %c0_5 = arith.constant 0 : index
    %6 = vector.load %arg5[%c0_4, %c0_5] : memref<1x256xf32, #tpu.memory_space<vmem>>, vector<1x256xf32>
    %7 = vector.broadcast %6 : vector<1x256xf32> to vector<16x256xf32>
    %8 = arith.addf %5, %7 : vector<16x256xf32>
    %cst_6 = arith.constant 0.000000e+00 : f32
    %9 = vector.broadcast %cst_6 : f32 to vector<16x256xf32>
    %10 = arith.maximumf %8, %9 : vector<16x256xf32>
    %c0_7 = arith.constant 0 : index
    %c0_8 = arith.constant 0 : index
    %11 = vector.load %arg9[%c0_7, %c0_8] : memref<16x128xf32, #tpu.memory_space<vmem>>, vector<16x128xf32>
    %12 = arith.truncf %10 : vector<16x256xf32> to vector<16x256xbf16>
    %c0_9 = arith.constant 0 : index
    %c0_10 = arith.constant 0 : index
    %13 = vector.load %arg6[%c0_9, %c0_10] : memref<256x128xbf16, #tpu.memory_space<vmem>>, vector<256x128xbf16>
    %cst_11 = arith.constant dense<0.000000e+00> : vector<16x128xf32>
    %14 = tpu.matmul %12, %13, %cst_11 {dimension_numbers = #tpu.dot_dimension_numbers<[1], [0], [0], [1], [0, 0, 1, 1], [], []>} : vector<16x256xbf16>, vector<256x128xbf16>, vector<16x128xf32> -> vector<16x128xf32>
    %15 = arith.addf %11, %14 : vector<16x128xf32>
    %c0_12 = arith.constant 0 : index
    %c0_13 = arith.constant 0 : index
    %16 = vector.load %arg9[%c0_12, %c0_13] : memref<16x128xf32, #tpu.memory_space<vmem>>, vector<16x128xf32>
    tpu.vector_store %arg9[%c0_12, %c0_13], %15 {strides = array<i32>} : memref<16x128xf32, #tpu.memory_space<vmem>>, vector<16x128xf32>,
    %c0_i32_14 = arith.constant 0 : i32
    %17 = arith.cmpi eq, %arg2, %c0_i32_14 : i32
    %18 = arith.extui %17 : i1 to i32
    %c0_i32_15 = arith.constant 0 : i32
    %19 = arith.cmpi ne, %18, %c0_i32_15 : i32
    scf.if %19 {
      %c0_16 = arith.constant 0 : index
      %c0_17 = arith.constant 0 : index
      %20 = vector.load %arg9[%c0_16, %c0_17] : memref<16x128xf32, #tpu.memory_space<vmem>>, vector<16x128xf32>
      %c0_18 = arith.constant 0 : index
      %c0_19 = arith.constant 0 : index
      %21 = vector.load %arg8[%c0_18, %c0_19] : memref<16x128xf32, #tpu.memory_space<vmem>>, vector<16x128xf32>
      tpu.vector_store %arg8[%c0_18, %c0_19], %20 {strides = array<i32>} : memref<16x128xf32, #tpu.memory_space<vmem>>, vector<16x128xf32>,
    } else {
    }
    return
  }
  func.func @transform_0(%arg0: i32, %arg1: i32, %arg2: i32) -> (i32, i32) {
    %c0_i32 = arith.constant 0 : i32
    %c0_i32_0 = arith.constant 0 : i32
    return %arg0, %c0_i32 : i32, i32
  }
  func.func @transform_1(%arg0: i32, %arg1: i32, %arg2: i32) -> (i32, i32) {
    %c0_i32 = arith.constant 0 : i32
    %c0_i32_0 = arith.constant 0 : i32
    return %c0_i32, %arg2 : i32, i32
  }
  func.func @transform_2(%arg0: i32, %arg1: i32, %arg2: i32) -> (i32, i32) {
    %c0_i32 = arith.constant 0 : i32
    %c0_i32_0 = arith.constant 0 : i32
    return %c0_i32, %arg2 : i32, i32
  }
  func.func @transform_3(%arg0: i32, %arg1: i32, %arg2: i32) -> (i32, i32) {
    %c0_i32 = arith.constant 0 : i32
    return %arg2, %arg1 : i32, i32
  }
  func.func @transform_4(%arg0: i32, %arg1: i32, %arg2: i32) -> (i32, i32) {
    %c0_i32 = arith.constant 0 : i32
    %c0_i32_0 = arith.constant 0 : i32
    return %c0_i32, %arg1 : i32, i32
  }
  func.func @transform_5(%arg0: i32, %arg1: i32, %arg2: i32) -> (i32, i32) {
    %c0_i32 = arith.constant 0 : i32
    return %arg0, %arg1 : i32, i32
  }
}

</mosaic_0001>

<bundles_post_ra>
// kernel: tpu_custom_call.1
= control target key start
LH: loop header
LB: loop body
LE: loop exit
PB: predicated region body
PF: predicated region fallthrough
CT: control target
= control target key end

     0   :  { %10 = vsyncpa [#allocation4], 0  ;;  %s740_s0 = inlined_call_operand.hbm [shape: bf16[16,128], index: 0, kind: input, shape index: {}]   ;;  %s741_s1 = inlined_call_operand.hbm [shape: bf16[128,256], index: 1, kind: input, shape index: {}]   ;;  %s742_s2 = inlined_call_operand.vmem [shape: f32[1,256], index: 2, kind: input, shape index: {}]   ;;  %s743_s3 = inlined_call_operand.hbm [shape: bf16[256,128], index: 3, kind: input, shape index: {}]   ;;  %s744_s4 = inlined_call_operand.vmem [shape: f32[1,128], index: 4, kind: input, shape index: {}]   ;;  %s745_s5 = inlined_call_operand.hbm [shape: f32[16,128], index: 5, kind: output, shape index: {}]  }
   0x1   :  { %11 = vsyncpa [#allocation7], 0 }
   0x2   :  { %12 = vsyncpa [#allocation5], 0  ;;  %s641_s18 = smov [#allocation6]   ;;  %s547_s22 = scalar_lea.hbm %s741_s1, 2048 }
   0x3   :  { %s30_s19 = sshll.u32 %s641_s18, 4  ;;  %p548_p0 = scmp.ne.s32.totalorder %s741_s1, %s547_s22  ;;  %s31_s19 = int_to_ptr.vmem [resolvable:$true] %s30_s19 }
   0x4   :  { %p551_p1 = scmp.lt.u32.totalorder %s547_s22, %s741_s1 }
   0x6   :  { %p553_p2 = pnand %p551_p1, %p548_p0 }
   0x8   :  { %556 = shalt.err (!%p553_p2)
}
   0x9   :  { %s557_s27 = scalar_lea.vmem %s31_s19, 2048  ;;  %p562_p4 = scmp.lt.s32.totalorder %s31_s19, %s31_s19 }
   0xa   :  { %p558_p3 = scmp.ne.s32.totalorder %s31_s19, %s557_s27  ;;  %p563_p5 = scmp.lt.s32.totalorder %s557_s27, %s557_s27 }
   0xc   :  { %p564_p6 = por %p563_p5, %p562_p4 }
   0xe   :  { %p565_p7 = pnand %p564_p6, %p558_p3 }
  0x10   :  { %568 = shalt.err (!%p565_p7)
}
  0x11   :  { %s642_s28 = smov 128   ;;  %s643_s29 = smov 8  }
  0x12   :  { %36 = dma.hbm_to_vmem [thread:$0]  %s741_s1, 2048, %s31_s19, [#allocation7], %s642_s28, %s642_s28, %s643_s29  }
  0x13   :  { %s644_s7 = smov [#allocation3]   ;;  %s569_s11 = scalar_lea.hbm %s740_s0, 128 }
  0x14   :  { %s18_s8 = sshll.u32 %s644_s7, 4  ;;  %p570_p8 = scmp.ne.s32.totalorder %s740_s0, %s569_s11  ;;  %s19_s8 = int_to_ptr.vmem [resolvable:$true] %s18_s8 }
  0x15   :  { %p573_p9 = scmp.lt.u32.totalorder %s569_s11, %s740_s0 }
  0x17   :  { %p575_p10 = pnand %p573_p9, %p570_p8 }
  0x19   :  { %578 = shalt.err (!%p575_p10)
}
  0x1a   :  { %s579_s16 = scalar_lea.vmem %s19_s8, 128  ;;  %p584_p12 = scmp.lt.s32.totalorder %s19_s8, %s19_s8 }
  0x1b   :  { %p580_p11 = scmp.ne.s32.totalorder %s19_s8, %s579_s16  ;;  %p585_p13 = scmp.lt.s32.totalorder %s579_s16, %s579_s16 }
  0x1d   :  { %p586_p0 = por %p585_p13, %p584_p12 }
  0x1f   :  { %p587_p1 = pnand %p586_p0, %p580_p11 }
  0x21   :  { %590 = shalt.err (!%p587_p1)
}
  0x22   :  { %s645_s1 = smov 64   ;;  %s646_s17 = smov 4  }
  0x23   :  { %24 = dma.hbm_to_vmem [thread:$0]  %s740_s0, 128, %s19_s8, [#allocation4], %s645_s1, %s645_s1, %s646_s17  }
  0x24   :  { %s647_s20 = smov [#allocation8]   ;;  %s591_s24 = scalar_lea.hbm %s743_s3, 2048 }
  0x25   :  { %s44_s21 = sshll.u32 %s647_s20, 4  ;;  %p592_p2 = scmp.ne.s32.totalorder %s743_s3, %s591_s24  ;;  %s45_s21 = int_to_ptr.vmem [resolvable:$true] %s44_s21 }
  0x26   :  { %p595_p3 = scmp.lt.u32.totalorder %s591_s24, %s743_s3 }
  0x28   :  { %p597_p4 = pnand %p595_p3, %p592_p2 }
  0x2a   :  { %600 = shalt.err (!%p597_p4)
}
  0x2b   :  { %s601_s6 = scalar_lea.vmem %s45_s21, 2048  ;;  %p606_p6 = scmp.lt.s32.totalorder %s45_s21, %s45_s21 }
  0x2c   :  { %p602_p5 = scmp.ne.s32.totalorder %s45_s21, %s601_s6  ;;  %p607_p7 = scmp.lt.s32.totalorder %s601_s6, %s601_s6 }
  0x2e   :  { %p608_p8 = por %p607_p7, %p606_p6 }
  0x30   :  { %p609_p9 = pnand %p608_p8, %p602_p5 }
  0x32   :  { %612 = shalt.err (!%p609_p9)
}
  0x33   :  { %50 = dma.hbm_to_vmem [thread:$0]  %s743_s3, 2048, %s45_s21, [#allocation7], %s645_s1, %s645_s1, %s646_s17  }
  0x34   :  { %635 = dma.done.wait [#allocation4], 128  }
  0x35   :  { %636 = vsyncadd [#allocation4], 4294967168 }
  0x36   :  { %637 = dma.done.wait [#allocation7], 4096  }
  0x37   :  { %638 = vsyncadd [#allocation7], 4294963200  ;;  %v648_v0 = vmov 0   ;;  %v506_v1 = vld [vmem:[#allocation6 + $0x4] ss:$8 sps:$4 sm:$0xff]   ;;  %v535_v16 = vld [vmem:[#allocation8 + $0x50] sm:$0xff]   ;;  %v96_v34 = vlaneseq }
  0x38   :  { %224 = vmatprep.mubr.bf16.mxu0 %v648_v0  ;;  %v508_v2 = vld [vmem:[#allocation6] ss:$8 sps:$4 sm:$0xff]   ;;  %192 = vmatprep.subr.bf16.mxu0 %v506_v1  ;;  %v509_v3 = vld [vmem:[#allocation6 + $0x14] ss:$8 sps:$4 sm:$0xff]   ;;  %v511_v4 = vld [vmem:[#allocation6 + $0x10] ss:$8 sps:$4 sm:$0xff]  }
  0x39   :  { %193 = vmatpush1.bf16.msra.mxu0 %v508_v2  ;;  %v512_v5 = vld [vmem:[#allocation6 + $0x24] ss:$8 sps:$4 sm:$0xff]   ;;  %v514_v6 = vld [vmem:[#allocation6 + $0x20] ss:$8 sps:$4 sm:$0xff]   ;;  %v515_v7 = vld [vmem:[#allocation6 + $0x34] ss:$8 sps:$4 sm:$0xff]  }
  0x3a   :  { %194 = vmatprep.subr.bf16.mxu0 %v509_v3  ;;  %v517_v8 = vld [vmem:[#allocation6 + $0x30] ss:$8 sps:$4 sm:$0xff]   ;;  %v518_v9 = vld [vmem:[#allocation6 + $0x44] ss:$8 sps:$4 sm:$0xff]   ;;  %v520_v11 = vld [vmem:[#allocation6 + $0x40] ss:$8 sps:$4 sm:$0xff]  }
  0x3b   :  { %v531_v10 = vld [vmem:[#allocation8 + $0x40] sm:$0xff]   ;;  %v521_v13 = vld [vmem:[#allocation6 + $0x54] ss:$8 sps:$4 sm:$0xff]   ;;  %v533_v14 = vld [vmem:[#allocation8 + $0x48] sm:$0xff]   ;;  %v97_v35 = vshrl.u32 %v96_v34, 7  ;;  %s649_s10 = smov [#allocation9]  }
  0x3c   :  { %v532_v12 = vld [vmem:[#allocation8] sm:$0xff]   ;;  %475 = vmatprep.subr.bf16.mxu1 %v531_v10  ;;  %v534_v15 = vld [vmem:[#allocation8 + $0x8] sm:$0xff]   ;;  %v523_v17 = vld [vmem:[#allocation6 + $0x50] ss:$8 sps:$4 sm:$0xff]   ;;  %s428_s11 = sshll.u32 %s649_s10, 4  ;;  %s429_s11 = int_to_ptr.vmem [resolvable:$true] %s428_s11 }
  0x3d   :  { %195 = vmatpush1.bf16.msra.mxu0 %v511_v4  ;;  %476 = vmatpush3.bf16.msra.mxu1 %v532_v12  ;;  %v524_v18 = vld [vmem:[#allocation6 + $0x64] ss:$8 sps:$4 sm:$0xff]   ;;  %v536_v19 = vld [vmem:[#allocation8 + $0x10] sm:$0xff]   ;;  %v537_v20 = vld [vmem:[#allocation8 + $0x58] sm:$0xff]   ;;  %v98_v36 = vsub.s32 0, %v97_v35  ;;  %v102_v38 = vsub.s32 1, %v97_v35  ;;  %p618_p11 = scmp.lt.s32.totalorder %s429_s11, %s429_s11 }
  0x3e   :  { %196 = vmatprep.subr.bf16.mxu0 %v512_v5  ;;  %477 = vmatprep.subr.bf16.mxu1 %v533_v14  ;;  %v526_v21 = vld [vmem:[#allocation6 + $0x60] ss:$8 sps:$4 sm:$0xff]   ;;  %v527_v22 = vld [vmem:[#allocation6 + $0x74] ss:$8 sps:$4 sm:$0xff]   ;;  %v529_v25 = vld [vmem:[#allocation6 + $0x70] ss:$8 sps:$4 sm:$0xff]  }
  0x3f   :  { %v538_v23 = vld [vmem:[#allocation8 + $0x18] sm:$0xff]   ;;  %v539_v24 = vld [vmem:[#allocation8 + $0x60] sm:$0xff]   ;;  %v541_v27 = vld [vmem:[#allocation8 + $0x68] sm:$0xff]   ;;  %s613_s12 = scalar_lea.vmem %s429_s11, 256 }
  0x40   :  { %v540_v26 = vld [vmem:[#allocation8 + $0x20] sm:$0xff]   ;;  %v530_v28 = vld [vmem:[#allocation3] sm:$0xff]   ;;  %v542_v29 = vld [vmem:[#allocation8 + $0x28] sm:$0xff]   ;;  %p614_p10 = scmp.ne.s32.totalorder %s429_s11, %s613_s12  ;;  %p619_p12 = scmp.lt.s32.totalorder %s613_s12, %s613_s12 }
  0x41   :  { %197 = vmatpush1.bf16.msra.mxu0 %v514_v6  ;;  %478 = vmatpush3.bf16.msra.mxu1 %v534_v15  ;;  %v543_v30 = vld [vmem:[#allocation8 + $0x70] sm:$0xff]   ;;  %v545_v32 = vld [vmem:[#allocation8 + $0x78] sm:$0xff]  }
  0x42   :  { %198 = vmatprep.subr.bf16.mxu0 %v515_v7  ;;  %479 = vmatprep.subr.bf16.mxu1 %v535_v16  ;;  %v544_v31 = vld [vmem:[#allocation8 + $0x30] sm:$0xff]   ;;  %v546_v33 = vld [vmem:[#allocation8 + $0x38] sm:$0xff]   ;;  %p620_p13 = por %p619_p12, %p618_p11 }
  0x43   :  { %v94_v37 = vld [vmem:[%s742_s2] sm:$0x3] }
  0x44   :  { %v99_v39 = vrot.slane %v94_v37, %v98_v36  ;;  %v103_v40 = vrot.slane %v94_v37, %v102_v38  ;;  %v441_v56 = vld [vmem:[%s744_s4] ss:$0 sm:$0xff]  ;;  %p621_p0 = pnand %p620_p13, %p614_p10 }
  0x45   :  { %199 = vmatpush1.bf16.msra.mxu0 %v517_v8  ;;  %480 = vmatpush3.bf16.msra.mxu1 %v536_v19 }
  0x46   :  { %200 = vmatprep.subr.bf16.mxu0 %v518_v9  ;;  %481 = vmatprep.subr.bf16.mxu1 %v537_v20 }
  0x49   :  { %201 = vmatpush1.bf16.msra.mxu0 %v520_v11  ;;  %482 = vmatpush3.bf16.msra.mxu1 %v538_v23 }
  0x4a   :  { %202 = vmatprep.subr.bf16.mxu0 %v521_v13  ;;  %483 = vmatprep.subr.bf16.mxu1 %v539_v24 }
  0x4d   :  { %203 = vmatpush1.bf16.msra.mxu0 %v523_v17  ;;  %484 = vmatpush3.bf16.msra.mxu1 %v540_v26 }
  0x4e   :  { %204 = vmatprep.subr.bf16.mxu0 %v524_v18  ;;  %485 = vmatprep.subr.bf16.mxu1 %v541_v27 }
  0x51   :  { %205 = vmatpush1.bf16.msra.mxu0 %v526_v21  ;;  %486 = vmatpush3.bf16.msra.mxu1 %v542_v29 }
  0x52   :  { %206 = vmatprep.subr.bf16.mxu0 %v527_v22  ;;  %487 = vmatprep.subr.bf16.mxu1 %v543_v30 }
  0x55   :  { %207 = vmatpush1.bf16.msra.mxu0 %v529_v25  ;;  %488 = vmatpush3.bf16.msra.mxu1 %v544_v31 }
  0x56   :  { %489 = vmatprep.subr.bf16.mxu1 %v545_v32 }
  0x58   :  { %225 = vmatmul.mubr.bf16.vlgmr.msra.gmra.mrb[0].mxu0 %v530_v28 }
  0x59   :  { %490 = vmatpush3.bf16.msra.mxu1 %v546_v33 }
 0x12b   :  { %v226_v41 = vpop.f32.mrb[0].mxu0 }
 0x12c   :  { %v227_v42 = vadd.f32 %v226_v41, %v99_v39  ;;  %v228_v43 = vpop.f32.mrb[1].mxu0 }
 0x12d   :  { %v229_v44 = vadd.f32 %v228_v43, %v103_v40  ;;  %v230_v45 = vpop.f32.mrb[2].mxu0 }
 0x12e   :  { %v231_v46 = vadd.f32 %v230_v45, %v99_v39  ;;  %v232_v47 = vpop.f32.mrb[3].mxu0  ;;  %v235_v49 = vmax.f32 %v227_v42, 0.0 }
 0x12f   :  { %v233_v48 = vadd.f32 %v232_v47, %v103_v40  ;;  %v236_v51 = vmax.f32 %v229_v44, 0.0 }
 0x130   :  { %v237_v50 = vmax.f32 %v231_v46, 0.0 }
 0x131   :  { %v238_v52 = vmax.f32 %v233_v48, 0.0 }
 0x132   :  { %v241_v53 = vpack.c.bf16 %v237_v50, %v235_v49 }
 0x133   :  { %v242_v54 = vpack.c.bf16 %v238_v52, %v236_v51 }
 0x135   :  { %403 = vmatprep.mubr.bf16.mxu1 %v242_v54 }
 0x136   :  { %404 = vmatmul.mubr.bf16.vlgmr.msra.gmra.mrb[0].mxu1 %v241_v53 }
 0x209   :  { %v491_v55 = vpop.f32.mrb[0].mxu1 }
 0x20a   :  { %v492_v57 = vpop.f32.mrb[1].mxu1 }
 0x20b   :  { %v493_v58 = vadd.f32 %v492_v57, %v491_v55  ;;  %v494_v59 = vpop.f32.mrb[2].mxu1 }
 0x20c   :  { %v495_v60 = vpop.f32.mrb[3].mxu1 }
 0x20d   :  { %v412_v61 = vadd.f32 %v493_v58, %v441_v56  ;;  %v496_v62 = vadd.f32 %v495_v60, %v494_v59 }
 0x20f   :  { %421 = vst [vmem:[#allocation9] sm:$0xff] %v412_v61  ;;  %v413_v63 = vadd.f32 %v496_v62, %v441_v56 }
 0x211   :  { %422 = vst [vmem:[#allocation9 + $0x8] sm:$0xff] %v413_v63 }
 0x212   :  { %624 = shalt.err (!%p621_p0)
}
 0x213   :  { %s625_s14 = scalar_lea.hbm %s745_s5, 256 }
 0x214   :  { %p626_p1 = scmp.ne.s32.totalorder %s745_s5, %s625_s14  ;;  %p629_p2 = scmp.lt.u32.totalorder %s625_s14, %s745_s5 }
 0x216   :  { %p631_p3 = pnand %p629_p2, %p626_p1 }
 0x218   :  { %634 = shalt.err (!%p631_p3)
}
 0x219   :  { %434 = dma.vmem_to_hbm [thread:$0]  %s429_s11, 256, %s745_s5, [#allocation5], %s642_s28, %s642_s28, %s643_s29  }
 0x21a   :  { %639 = dma.done.wait [#allocation5], 256  }
 0x21b   :  { %640 = vsyncadd [#allocation5], 4294967040 }
 0x21c   :  { %438 = vsyncpa [#allocation4], 1 }
 0x21d   :  { %439 = vsyncpa [#allocation7], 1 }
 0x21e   :  { %440 = vsyncpa [#allocation5], 1 }

</bundles_post_ra>
